<compile_context>
chip_gen: v5e
topology: v5e:2x2
jax: 0.10.0
libtpu: 0.0.40
codegen_flags: <defaults>
</compile_context>

<pallas_src>
import functools
import math

import jax
import jax.numpy as jnp
from jax import lax
from jax.experimental import pallas as pl
from jax.experimental.pallas import tpu as pltpu


def _posenc_kernel(x_ref, o_ref, *, max_len):
    """Adds sinusoidal positional encoding to a (Bb, L, C) block of x."""
    _, L, C = x_ref.shape

    # Sequence-position index (axis 1) and channel index (axis 2) as iotas.
    pos = lax.broadcasted_iota(jnp.int32, (1, L, C), 1).astype(jnp.float32)
    k_f = lax.broadcasted_iota(jnp.int32, (1, L, C), 2).astype(jnp.float32)

    # i = k // 2 and parity(k), computed in float (exact for k < 2^23) to
    # avoid vector integer division.
    i_f = jnp.floor(k_f * 0.5)
    is_even = (k_f - 2.0 * i_f) < 0.5

    # pe = pos / max_len ** (2*i / C)  ==  pos * exp(-i * 2*ln(max_len) / C)
    inv_freq = jnp.exp(i_f * jnp.float32(-2.0 * math.log(max_len) / C))
    angle = pos * inv_freq                                      # (1, L, C)
    pe = jnp.where(is_even, jnp.sin(angle), jnp.cos(angle))     # (1, L, C)

    # Broadcast-add over the Bb batch rows of this block.
    o_ref[...] = (x_ref[...].astype(jnp.float32) + pe).astype(o_ref.dtype)


def _pick_batch_tile(batch, block_row_bytes, vmem_budget=4 * 1024 * 1024,
                     min_grid=2):
    """Largest batch tile whose double-buffered block fits the VMEM budget,
    preferring to leave >= min_grid grid steps (keeps both v7x TCs busy)."""
    divisors = [d for d in range(1, batch + 1) if batch % d == 0]
    fitting = [d for d in divisors if 2 * d * block_row_bytes <= vmem_budget]
    if not fitting:
        fitting = [1]
    preferred = [d for d in fitting if batch // d >= min_grid]
    return max(preferred) if preferred else max(fitting)


def positional_encoding(x, max_len=10000):
    B, L, C = x.shape
    bb = _pick_batch_tile(B, L * C * x.dtype.itemsize)
    grid_steps = B // bb

    kernel = functools.partial(_posenc_kernel, max_len=float(max_len))
    elems = B * L * C
    cost = pl.CostEstimate(
        flops=4 * elems,                              # add + cheap PE arithmetic
        transcendentals=3 * grid_steps * L * C,       # exp, sin, cos per block
        bytes_accessed=2 * elems * x.dtype.itemsize,  # read x, write out
    )

    return pl.pallas_call(
        kernel,
        out_shape=jax.ShapeDtypeStruct((B, L, C), x.dtype),
        grid_spec=pltpu.PrefetchScalarGridSpec(
            num_scalar_prefetch=0,
            grid=(grid_steps,),
            in_specs=[pl.BlockSpec((bb, L, C), lambda b: (b, 0, 0))],
            out_specs=pl.BlockSpec((bb, L, C), lambda b: (b, 0, 0)),
        ),
        compiler_params=pltpu.CompilerParams(
            dimension_semantics=("parallel",)),
        cost_estimate=cost,
    )(x)


def reference_forward(x, max_len=10000):
    """Pure-JAX reference mirroring the PyTorch module exactly."""
    _, L, C = x.shape
    k = jnp.arange(C)[None, :]
    pos = jnp.arange(L, dtype=jnp.float32)[:, None]
    i = k // 2
    pe = pos / (max_len ** (2.0 * i / C))
    pe = jnp.where(k % 2 == 0, jnp.sin(pe), jnp.cos(pe))
    return x + pe[None, :, :].astype(x.dtype)


if __name__ == "__main__":
    B, L, C = 4, 16, 32
    key = jax.random.PRNGKey(0)
    x = jax.random.normal(key, (B, L, C), dtype=jnp.float32)

    out = positional_encoding(x, max_len=10000)
    out = jax.block_until_ready(out)

    ref = reference_forward(x, max_len=10000)
    assert out.shape == (B, L, C)
    assert jnp.allclose(out, ref, atol=1e-4, rtol=1e-4), "mismatch vs JAX reference"

    print("KERNEL_OK")
</pallas_src>

<mosaic_0001>
module attributes {stable_mosaic.version = 11 : i64} {
  func.func @_posenc_kernel(%arg0: i32, %arg1: memref<2x16x32xf32, #tpu.memory_space<vmem>>, %arg2: memref<2x16x32xf32, #tpu.memory_space<vmem>>) attributes {dimension_semantics = [#tpu.dimension_semantics<parallel>], iteration_bounds = array<i64: 2>, scalar_prefetch = 0 : i64, scratch_operands = 0 : i64, tpu.core_type = #tpu.core_type<tc>, window_params = [{transform_indices = @transform_0, window_bounds = array<i64: 2, 16, 32>}, {transform_indices = @transform_1, window_bounds = array<i64: 2, 16, 32>}]} {
    %0 = tpu.iota {dimensions = array<i32: 1>} : vector<1x16x32xi32>
    %1 = arith.sitofp %0 : vector<1x16x32xi32> to vector<1x16x32xf32>
    %2 = tpu.iota {dimensions = array<i32: 2>} : vector<1x16x32xi32>
    %3 = arith.sitofp %2 : vector<1x16x32xi32> to vector<1x16x32xf32>
    %cst = arith.constant 5.000000e-01 : f32
    %4 = vector.broadcast %cst : f32 to vector<1x16x32xf32>
    %5 = arith.mulf %3, %4 : vector<1x16x32xf32>
    %6 = math.floor %5 : vector<1x16x32xf32>
    %cst_0 = arith.constant 2.000000e+00 : f32
    %7 = vector.broadcast %cst_0 : f32 to vector<1x16x32xf32>
    %8 = arith.mulf %7, %6 : vector<1x16x32xf32>
    %9 = arith.subf %3, %8 : vector<1x16x32xf32>
    %cst_1 = arith.constant 5.000000e-01 : f32
    %10 = vector.broadcast %cst_1 : f32 to vector<1x16x32xf32>
    %11 = arith.cmpf olt, %9, %10 : vector<1x16x32xf32>
    %cst_2 = arith.constant -0.575646281 : f32
    %12 = vector.broadcast %cst_2 : f32 to vector<1x16x32xf32>
    %13 = arith.mulf %6, %12 : vector<1x16x32xf32>
    %14 = math.exp %13 : vector<1x16x32xf32>
    %15 = arith.mulf %1, %14 : vector<1x16x32xf32>
    %16 = math.sin %15 : vector<1x16x32xf32>
    %17 = math.cos %15 : vector<1x16x32xf32>
    %18 = arith.select %11, %16, %17 : vector<1x16x32xi1>, vector<1x16x32xf32>
    %c0 = arith.constant 0 : index
    %c0_3 = arith.constant 0 : index
    %c0_4 = arith.constant 0 : index
    %19 = vector.load %arg1[%c0, %c0_3, %c0_4] : memref<2x16x32xf32, #tpu.memory_space<vmem>>, vector<2x16x32xf32>
    %20 = vector.broadcast %18 : vector<1x16x32xf32> to vector<2x16x32xf32>
    %21 = arith.addf %19, %20 : vector<2x16x32xf32>
    %c0_5 = arith.constant 0 : index
    %c0_6 = arith.constant 0 : index
    %c0_7 = arith.constant 0 : index
    %22 = vector.load %arg2[%c0_5, %c0_6, %c0_7] : memref<2x16x32xf32, #tpu.memory_space<vmem>>, vector<2x16x32xf32>
    tpu.vector_store %arg2[%c0_5, %c0_6, %c0_7], %21 {strides = array<i32>} : memref<2x16x32xf32, #tpu.memory_space<vmem>>, vector<2x16x32xf32>,
    return
  }
  func.func @transform_0(%arg0: i32) -> (i32, i32, i32) {
    %c0_i32 = arith.constant 0 : i32
    %c0_i32_0 = arith.constant 0 : i32
    %c0_i32_1 = arith.constant 0 : i32
    return %arg0, %c0_i32, %c0_i32_0 : i32, i32, i32
  }
  func.func @transform_1(%arg0: i32) -> (i32, i32, i32) {
    %c0_i32 = arith.constant 0 : i32
    %c0_i32_0 = arith.constant 0 : i32
    %c0_i32_1 = arith.constant 0 : i32
    return %arg0, %c0_i32, %c0_i32_0 : i32, i32, i32
  }
}

</mosaic_0001>

<bundles_post_ra>
// kernel: tpu_custom_call.1
= control target key start
LH: loop header
LB: loop body
LE: loop exit
PB: predicated region body
PF: predicated region fallthrough
CT: control target
= control target key end

     0   :  { %6 = vsyncpa [#allocation3], 0  ;;  %s1416_s0 = inlined_call_operand.hbm [shape: f32[4,16,32], index: 0, kind: input, shape index: {}]   ;;  %s1417_s1 = inlined_call_operand.hbm [shape: f32[4,16,32], index: 1, kind: output, shape index: {}]  }
   0x1   :  { %8 = vsyncpa [#allocation3 + $0x1], 0 }
   0x2   :  { %9 = vsyncpa [#allocation4], 0 }
   0x3   :  { %11 = vsyncpa [#allocation4 + $0x1], 0  ;;  %s1091_s6 = smov 0   ;;  %s1093_s7 = smov 0  }
   0x4   :  { %s1095_s8 = smov 0   ;;  %s1097_s9 = smov 0  }
   0x5 LB: > { %s1112_s10 = sadd.s32 4294967295, %s1068_s9   ;;  %s881_s11 = sadd.s32 4294967294, %s1068_s9   ;;  %s1068_s9 = sphi %s1097_s9, %s1429_s9   ;;  %s1064_s8 = sphi %s1095_s8, %s1428_s8   ;;  %s1060_s7 = sphi %s1093_s7, %s1427_s7   ;;  %s1056_s6 = sphi %s1091_s6, %s1426_s6  }
   0x6   : > { %s1116_s12 = sadd.s32 1, %s1068_s9   ;;  %s24_s13 = sadd.s32 1, %s1064_s8 }
   0x7   : > { %s21_s14 = ssub.s32 %s1068_s9, %s1116_s12  ;;  %p31_p0 = scmp.ne.s32.totalorder %s1064_s8, %s1060_s7 }
   0x8   : > { %p22_p1 = scmp.eq.s32.totalorder %s21_s14, 0  ;;  %p32_p2 = scmp.eq.s32.totalorder %s1068_s9, 0 }
   0x9   : > { %p37_p3 = scmp.ne.s32.totalorder %s1060_s7, %s1056_s6  ;;  %p38_p4 = scmp.eq.s32.totalorder %s1112_s10, 0 }
   0xa   : > { %s1128_s15 = scalar_select %p22_p1, %s1064_s8, %s24_s13  }
   0xb   : > { %p1130_p5 = por %p32_p2, %p31_p0  ;;  %p1134_p6 = por %p38_p4, %p37_p3 }
   0xc   : > { %p61_p7 = scmp.eq.s32.totalorder %s1112_s10, 1  ;;  %p67_p8 = scmp.eq.s32.totalorder %s881_s11, 1 }
   0xd   : > { %p925_p10 = scmp.lt.s32.totalorder %s1068_s9, 2  ;;  %s87_s20 = sand.u32 1, %s1064_s8  }
   0xe   : > { %p1141_p11 = por %p61_p7, %p31_p0  ;;  %p1145_p12 = por %p67_p8, %p37_p3 }
   0xf   : > { %s910_s21 = sshll.u32 %s1068_s9, 5  ;;  %s884_s22 = sshll.u32 %s87_s20, 5 }
  0x10   : > { %s97_s25 = scalar_lea.hbm %s1416_s0, %s910_s21  ;;  %s91_s27 = scalar_lea.vmem [#allocation2], %s884_s22 }
  0x11   : > { %s98_s26 = sshll.u32 %s97_s25, 4  ;;  %s100_s28 = sshll.u32 %s91_s27, 4  ;;  %s99_s26 = int_to_ptr.hbm [resolvable:$true] %s98_s26  ;;  %s101_s28 = int_to_ptr.vmem [resolvable:$true] %s100_s28 }
  0x12   : > { %p1156_p13 = pnand %p925_p10, %p1130_p5  ;;  %p888_p0 = scmp.ge.s32.totalorder %s1068_s9, 1 }
  0x13   : > { %p108_p1 = scmp.lt.s32.totalorder %s1068_s9, 3  ;;  %s88_s30 = scalar_lea.sflag [#allocation3], %s87_s20 }
  0x14   : > { %s972_s2 = sshra.s32 %s99_s26, 4  ;;  %p976_p3 = pneg %p1156_p13  ;;  %s973_s2 = int_to_ptr.hbm [resolvable:$true] %s972_s2 }
  0x15   : > { %s974_s3 = scalar_lea.hbm %s973_s2, 32  ;;  %s979_s11 = scalar_lea.hbm %s1416_s0, 64 }
  0x16   : > { %p975_p2 = scmp.ne.s32.totalorder %s973_s2, %s974_s3  ;;  %p980_p5 = scmp.lt.s32.totalorder %s973_s2, %s1416_s0 }
  0x17   : > { %p981_p8 = scmp.lt.s32.totalorder %s979_s11, %s974_s3 }
  0x18   : > { %p977_p4 = pnand %p976_p3, %p975_p2 }
  0x19   : > { %p982_p10 = por %p981_p8, %p980_p5 }
  0x1a   : > { %p978_p7 = pneg %p977_p4 }
  0x1c   : > { %p983_p9 = pnand %p982_p10, %p978_p7 }
  0x1e   : > { %986 = shalt.err (!%p983_p9)
}
  0x1f   : > { %s1070_s16 = smov 128   ;;  %s1071_s20 = smov 8  }
  0x20   : > { %920 = dma.hbm_to_vmem [thread:$0]  (!%p1156_p13), %s99_s26, 512, %s101_s28, %s88_s30, %s1070_s16, %s1070_s16, %s1071_s20  }
  0x21   : > { %p109_p2 = pnand %p888_p0, %p108_p1 }
  0x22   : > { %s1177_s21 = sand.u32 (!%p109_p2), 1, %s1060_s7  }
  0x23   : > { %112 = sbr.rel (%p109_p2) target bundleno = 188 (0xbc), region = 24  ;;  %s889_s22 = sshll.u32 (!%p109_p2), %s1177_s21, 5 }
  0x24   : > { %s115_s23 = scalar_lea.sflag (!%p109_p2), [#allocation3], %s1177_s21  ;;  %s1183_s24 = scalar_lea.vmem (!%p109_p2), [#allocation2], %s889_s22 }
  0x28   : > { %1047 = dma.done.wait (%p1134_p6), %s115_s23, 512  }
  0x29   : > { %1049 = vsyncadd (%p1134_p6), %s115_s23, 4294966784  ;;  %v140_v0 = vlaneseq  ;;  %v1072_v37 = vmov 683565275   ;;  %v1073_v39 = vmov 2475754826   ;;  %s1367_s17 = scalar_lea.vmem [#allocation5], %s889_s22 }
  0x2a   : > { %v1074_v41 = vmov 2131351028   ;;  %v1075_v43 = vmov 2102212464   ;;  %v1076_v45 = vmov 920167782  }
  0x2b   : > { %v146_v1 = vand.u32 127, %v140_v0  ;;  %v141_v5 = vshrl.u32 %v140_v0, 7  ;;  %v1077_v54 = vmov 1326507024   ;;  %s912_s25 = sshll.u32 %s1112_s10, 5  ;;  %s805_s29 = sshll.u32 %s1367_s17, 4  ;;  %s806_s29 = int_to_ptr.vmem [resolvable:$true] %s805_s29 }
  0x2c   : > { %s804_s28 = scalar_lea.hbm %s1417_s1, %s912_s25  ;;  %s792_s30 = scalar_lea.sflag [#allocation4], %s1177_s21 }
  0x2d   : > { %v147_v2 = vcvt.s32.f32 %v146_v1  ;;  %v142_v10 = vadd.s32 8, %v141_v5  ;;  %v143_v11 = vcvt.s32.f32 %v141_v5  ;;  %s807_s10 = sshll.u32 %s804_s28, 4  ;;  %s1022_s11 = scalar_lea.hbm %s1417_s1, 64  ;;  %s808_s10 = int_to_ptr.hbm [resolvable:$true] %s807_s10 }
  0x2e   : > { %s1016_s2 = sshra.s32 %s808_s10, 4  ;;  %s1017_s2 = int_to_ptr.hbm [resolvable:$true] %s1016_s2 }
  0x2f   : > { %v148_v3 = vmul.f32 0.5, %v147_v2  ;;  %v144_v12 = vcvt.s32.f32 %v142_v10  ;;  %s1018_s3 = scalar_lea.hbm %s1017_s2, 32  ;;  %p1023_p0 = scmp.lt.s32.totalorder %s1017_s2, %s1417_s1 }
  0x30   : > { %p1019_p6 = scmp.ne.s32.totalorder %s1017_s2, %s1018_s3  ;;  %p1024_p1 = scmp.lt.s32.totalorder %s1022_s11, %s1018_s3 }
  0x31   : > { %v149_v4 = vfloor.f32 %v148_v3 }
  0x32   : > { %p1020_p9 = pnand %p1019_p6, %p1141_p11  ;;  %p1025_p3 = por %p1024_p1, %p1023_p0 }
  0x33   : > { %v150_v6 = vmul.f32 2.0, %v149_v4  ;;  %v153_v7 = vmul.f32 -0.5756463, %v149_v4 }
  0x34   : > { %p1021_p13 = pneg %p1020_p9 }
  0x35   : > { %v1189_v8 = vsub.f32 %v147_v2, %v150_v6  ;;  %v154_v9 = vmul.f32 1.442695, %v153_v7 }
  0x36   : > { %p1026_p4 = pnand %p1025_p3, %p1021_p13 }
  0x37   : > { %970 = vpow2.f32 %v154_v9 }
  0x3d   : > { %v971_v13 = vpop.eup %970 }
  0x3e   : > { %v1191_v14 = vmul.f32 %v971_v13, %v143_v11  ;;  %v1193_v15 = vmul.f32 %v971_v13, %v144_v12 }
  0x40   : > { %v158_v16 = vand.u32 2147483647, %v1191_v14  ;;  %v161_v17 = vand.u32 2139095040, %v1191_v14  ;;  %v316_v18 = vand.u32 2139095040, %v1193_v15  ;;  %v313_v19 = vand.u32 2147483647, %v1193_v15 }
  0x42   : > { %v162_v20 = vshrl.u32 %v161_v17, 23  ;;  %v165_v21 = vand.u32 8388607, %v158_v16  ;;  %v317_v22 = vshrl.u32 %v316_v18, 23  ;;  %v320_v26 = vand.u32 8388607, %v313_v19 }
  0x44   : > { %v891_v23 = vadd.s32 4294967169, %v162_v20  ;;  %v894_v24 = vadd.s32 4294967169, %v317_v22  ;;  %v166_v25 = vor.u32 8388608, %v165_v21  ;;  %v321_v32 = vor.u32 8388608, %v320_v26 }
  0x46   : > { %v168_v27 = vadd.s32 1, %v891_v23  ;;  %v323_v28 = vadd.s32 1, %v894_v24  ;;  %v1203_v30 = vshll.u32 %v166_v25, 8  ;;  %v1213_v48 = vshll.u32 %v321_v32, 8 }
  0x48   : > { %vm169_vm0 = vcmp.gt.s32.totalorder %v168_v27, 0  ;;  %vm324_vm1 = vcmp.gt.s32.totalorder %v323_v28, 0  ;;  %v207_v47 = vand.u32 65535, %v1203_v30  ;;  %v208_v52 = vshrl.u32 %v1203_v30, 16 }
  0x49   : > { %v170_v29 = vsel %vm169_vm0, %v168_v27, 0  ;;  %v325_v31 = vsel %vm324_vm1, %v323_v28, 0 }
  0x4a   : > { %v172_v33 = vand.u32 31, %v170_v29  ;;  %v1205_v34 = vshrl.u32 %v170_v29, 5  ;;  %v1207_v35 = vand.u32 31, %v325_v31  ;;  %v1231_v1 = vshrl.u32 %v325_v31, 5 }
  0x4c   : > { %v173_v36 = vsub.s32 32, %v172_v33  ;;  %v175_v38 = vshll.u32 %v1072_v37, %v172_v33  ;;  %v178_v40 = vshll.u32 %v1073_v39, %v172_v33  ;;  %v181_v42 = vshll.u32 %v1074_v41, %v172_v33 }
  0x4d   : > { %v184_v44 = vshll.u32 %v1075_v43, %v172_v33  ;;  %v187_v46 = vshll.u32 %v1076_v45, %v172_v33  ;;  %vm190_vm2 = vcmp.lt.s32.totalorder %v1205_v34, 1  ;;  %vm193_vm3 = vcmp.lt.s32.totalorder %v1205_v34, 4 }
  0x4e   : > { %v176_v49 = vshrl.u32 %v1073_v39, %v173_v36  ;;  %v179_v50 = vshrl.u32 %v1074_v41, %v173_v36  ;;  %v182_v51 = vshrl.u32 %v1075_v43, %v173_v36  ;;  %v185_v53 = vshrl.u32 %v1076_v45, %v173_v36 }
  0x4f   : > { %v188_v55 = vshrl.u32 %v1077_v54, %v173_v36  ;;  %v1222_v59 = vsub.s32 32, %v1207_v35  ;;  %v174_v60 = vshrl.u32 %v1072_v37, %v173_v36  ;;  %vm192_vm4 = vcmp.lt.s32.totalorder %v1205_v34, 3 }
  0x50   : > { %v177_v56 = vor.u32 %v176_v49, %v175_v38  ;;  %v180_v57 = vor.u32 %v179_v50, %v178_v40  ;;  %v183_v58 = vor.u32 %v182_v51, %v181_v42  ;;  %v186_v61 = vor.u32 %v185_v53, %v184_v44 }
  0x51   : > { %v189_v62 = vor.u32 %v188_v55, %v187_v46  ;;  %vm191_vm5 = vcmp.lt.s32.totalorder %v1205_v34, 2  ;;  %v330_v4 = vshll.u32 %v1072_v37, %v1207_v35  ;;  %v333_v5 = vshll.u32 %v1073_v39, %v1207_v35 }
  0x52   : > { %v198_v63 = vsel %vm190_vm2, %v177_v56, %v180_v57  ;;  %v202_v0 = vsel %vm190_vm2, %v180_v57, %v183_v58  ;;  %v199_v2 = vsel %vm193_vm3, %v186_v61, 920167782  ;;  %v195_v6 = vsel %vm193_vm3, %v183_v58, 2102212464 }
  0x53   : > { %v203_v3 = vsel %vm193_vm3, %v189_v62, 1326507024  ;;  %v200_v7 = vsel %vm192_vm4, %v183_v58, %v199_v2  ;;  %v331_v10 = vshrl.u32 %v1073_v39, %v1222_v59  ;;  %v194_v11 = vsel %vm190_vm2, %v174_v60, %v177_v56 }
  0x54   : > { %v204_v9 = vsel %vm192_vm4, %v186_v61, %v203_v3  ;;  %v201_v12 = vsel %vm191_vm5, %v198_v63, %v200_v7  ;;  %v334_v17 = vshrl.u32 %v1074_v41, %v1222_v59  ;;  %v196_v23 = vsel %vm192_vm4, %v180_v57, %v195_v6 }
  0x55   : > { %v205_v13 = vsel %vm191_vm5, %v202_v0, %v204_v9  ;;  %v231_v21 = vand.u32 65535, %v201_v12  ;;  %v232_v22 = vshrl.u32 %v201_v12, 16  ;;  %v1256_v24 = vor.u32 %v331_v10, %v330_v4 }
  0x56   : > { %v209_v18 = vand.u32 65535, %v205_v13  ;;  %v210_v20 = vshrl.u32 %v205_v13, 16  ;;  %v1258_v25 = vor.u32 %v334_v17, %v333_v5  ;;  %v336_v26 = vshll.u32 %v1074_v41, %v1207_v35 }
  0x57   : > { %v337_v31 = vshrl.u32 %v1075_v43, %v1222_v59  ;;  %v233_v33 = vmul.u32 %v231_v21, %v207_v47  ;;  %v234_v36 = vmul.u32 %v232_v22, %v207_v47  ;;  %v235_v38 = vmul.u32 %v231_v21, %v208_v52 }
  0x58   : > { %v211_v27 = vmul.u32 %v209_v18, %v207_v47  ;;  %v212_v28 = vmul.u32 %v210_v20, %v207_v47  ;;  %v213_v29 = vmul.u32 %v209_v18, %v208_v52  ;;  %v214_v32 = vmul.u32 %v210_v20, %v208_v52 }
  0x59   : > { %v236_v44 = vmul.u32 %v232_v22, %v208_v52  ;;  %v237_v49 = vshll.u32 %v234_v36, 16  ;;  %v238_v50 = vshrl.u32 %v234_v36, 16  ;;  %v239_v51 = vshll.u32 %v235_v38, 16 }
  0x5a   : > { %v215_v39 = vshll.u32 %v212_v28, 16  ;;  %v216_v40 = vshrl.u32 %v212_v28, 16  ;;  %v217_v42 = vshll.u32 %v213_v29, 16  ;;  %v218_v46 = vshrl.u32 %v213_v29, 16 }
  0x5b   : > { %v240_v53 = vshrl.u32 %v235_v38, 16  ;;  %v339_v55 = vshll.u32 %v1075_v43, %v1207_v35  ;;  %v1078_v56 = vmov 0   ;;  %vm241_vm7 = vc.u32 %v233_v33, %v237_v49 }
  0x5c   : > { %vm219_vm6 = vc.u32 %v211_v27, %v215_v39  ;;  %v221_v41 = vadd.s32 %v215_v39, %v211_v27  ;;  %v243_v47 = vadd.s32 %v237_v49, %v233_v33  ;;  %v340_v58 = vshrl.u32 %v1076_v45, %v1222_v59 }
  0x5d   : > { %v220_v57 = vsel %vm219_vm6, 1, %v1078_v56  ;;  %v242_v52 = vsel %vm241_vm7, 1, %v1078_v56  ;;  %v342_v61 = vshll.u32 %v1076_v45, %v1207_v35  ;;  %v338_v43 = vor.u32 %v337_v31, %v336_v26 }
  0x5e   : > { %v222_v60 = vadd.s32 %v220_v57, %v214_v32  ;;  %vm223_vm8 = vc.u32 %v221_v41, %v217_v42  ;;  %v244_v63 = vadd.s32 %v242_v52, %v236_v44  ;;  %vm245_vm9 = vc.u32 %v243_v47, %v239_v51 }
  0x5f   : > { %v224_v62 = vsel %vm223_vm8, 1, %v1078_v56  ;;  %v246_v2 = vsel %vm245_vm9, 1, %v1078_v56  ;;  %v341_v3 = vor.u32 %v340_v58, %v339_v55  ;;  %v343_v4 = vshrl.u32 %v1077_v54, %v1222_v59 }
  0x60   : > { %v226_v0 = vadd.s32 %v224_v62, %v222_v60  ;;  %v1275_v5 = vadd.s32 %v243_v47, %v239_v51  ;;  %v248_v6 = vadd.s32 %v246_v2, %v244_v63  ;;  %vm345_vm10 = vcmp.lt.s32.totalorder %v1231_v1, 1 }
  0x61   : > { %vm347_vm11 = vcmp.lt.s32.totalorder %v1231_v1, 3  ;;  %v344_v45 = vor.u32 %v343_v4, %v342_v61  ;;  %vm346_vm12 = vcmp.lt.s32.totalorder %v1231_v1, 2  ;;  %vm348_vm13 = vcmp.lt.s32.totalorder %v1231_v1, 4 }
  0x62   : > { %v227_v35 = vadd.s32 %v226_v0, %v216_v40  ;;  %v197_v7 = vsel %vm191_vm5, %v194_v11, %v196_v23  ;;  %v249_v9 = vadd.s32 %v248_v6, %v238_v50  ;;  %v353_v54 = vsel %vm345_vm10, %v1256_v24, %v1258_v25 }
  0x63   : > { %v354_v10 = vsel %vm348_vm13, %v341_v3, 920167782  ;;  %v357_v17 = vsel %vm345_vm10, %v1258_v25, %v338_v43  ;;  %v362_v34 = vand.u32 65535, %v1213_v48  ;;  %v358_v20 = vsel %vm348_vm13, %v344_v45, 1326507024 }
  0x64   : > { %v1289_v12 = vadd.s32 %v227_v35, %v218_v46  ;;  %v355_v13 = vsel %vm347_vm11, %v338_v43, %v354_v10  ;;  %v250_v11 = vadd.s32 %v249_v9, %v240_v53  ;;  %v363_v21 = vshrl.u32 %v1213_v48, 16 }
  0x65   : > { %v356_v18 = vsel %vm346_vm12, %v353_v54, %v355_v13  ;;  %v251_v22 = vmul.u32 %v1203_v30, %v197_v7  ;;  %v359_v23 = vsel %vm347_vm11, %v341_v3, %v358_v20  ;;  %v329_v36 = vshrl.u32 %v1072_v37, %v1222_v59 }
  0x66   : > { %vm253_vm14 = vc.u32 %v1289_v12, %v1275_v5  ;;  %v386_v26 = vand.u32 65535, %v356_v18  ;;  %v254_v27 = vadd.s32 1, %v250_v11  ;;  %v360_v28 = vsel %vm346_vm12, %v357_v17, %v359_v23 }
  0x67   : > { %v387_v29 = vshrl.u32 %v356_v18, 16  ;;  %v364_v31 = vand.u32 65535, %v360_v28  ;;  %v365_v32 = vshrl.u32 %v360_v28, 16  ;;  %v350_v51 = vsel %vm348_vm13, %v338_v43, 2102212464 }
  0x68   : > { %v255_v33 = vsel %vm253_vm14, %v254_v27, %v250_v11  ;;  %v390_v30 = vmul.u32 %v386_v26, %v363_v21  ;;  %v388_v44 = vmul.u32 %v386_v26, %v362_v34  ;;  %v349_v55 = vsel %vm345_vm10, %v329_v36, %v1256_v24 }
  0x69   : > { %v389_v38 = vmul.u32 %v387_v29, %v362_v34  ;;  %v256_v39 = vadd.s32 %v255_v33, %v251_v22  ;;  %v366_v40 = vmul.u32 %v364_v31, %v362_v34  ;;  %v367_v42 = vmul.u32 %v365_v32, %v362_v34 }
  0x6a   : > { %v368_v46 = vmul.u32 %v364_v31, %v363_v21  ;;  %v369_v41 = vmul.u32 %v365_v32, %v363_v21  ;;  %v391_v37 = vmul.u32 %v387_v29, %v363_v21  ;;  %v394_v59 = vshll.u32 %v390_v30, 16 }
  0x6b   : > { %v392_v49 = vshll.u32 %v389_v38, 16  ;;  %v257_v50 = vadd.s32 536870912, %v256_v39  ;;  %v370_v53 = vshll.u32 %v367_v42, 16  ;;  %v351_v60 = vsel %vm347_vm11, %v1258_v25, %v350_v51 }
  0x6c   : > { %v372_v57 = vshll.u32 %v368_v46, 16  ;;  %v371_v24 = vshrl.u32 %v367_v42, 16  ;;  %v393_v2 = vshrl.u32 %v389_v38, 16  ;;  %v373_v6 = vshrl.u32 %v368_v46, 16 }
  0x6d   : > { %v1316_v47 = vshrl.u32 %v257_v50, 30  ;;  %vm374_vm15 = vc.u32 %v366_v40, %v370_v53  ;;  %v376_v58 = vadd.s32 %v370_v53, %v366_v40  ;;  %vm396_vm0 = vc.u32 %v388_v44, %v392_v49 }
  0x6e   : > { %v375_v52 = vsel %vm374_vm15, 1, %v1078_v56  ;;  %v397_v61 = vsel %vm396_vm0, 1, %v1078_v56  ;;  %v398_v62 = vadd.s32 %v392_v49, %v388_v44  ;;  %v395_v45 = vshrl.u32 %v390_v30, 16 }
  0x6f   : > { %v259_v63 = vshll.u32 %v1316_v47, 30  ;;  %v377_v43 = vadd.s32 %v375_v52, %v369_v41  ;;  %vm378_vm1 = vc.u32 %v376_v58, %v372_v57  ;;  %v399_v3 = vadd.s32 %v397_v61, %v391_v37 }
  0x70   : > { %v379_v0 = vsel %vm378_vm1, 1, %v1078_v56  ;;  %vm400_vm2 = vc.u32 %v398_v62, %v394_v59  ;;  %v402_v10 = vadd.s32 %v398_v62, %v394_v59  ;;  %v352_v13 = vsel %vm346_vm12, %v349_v55, %v351_v60 }
  0x71   : > { %v260_v4 = vsub.s32 %v256_v39, %v259_v63  ;;  %v381_v35 = vadd.s32 %v379_v0, %v377_v43  ;;  %v401_v25 = vsel %vm400_vm2, 1, %v1078_v56  ;;  %v406_v21 = vmul.u32 %v1213_v48, %v352_v13 }
  0x72   : > { %v403_v7 = vadd.s32 %v401_v25, %v399_v3  ;;  %v252_v56 = vadd.s32 %v1275_v5, %v1289_v12  ;;  %v282_v46 = vsub.s32 4, %v1316_v47  ;;  %vm160_vm6 = vcmp.lt.s32.totalorder %v1191_v14, 0 }
  0x73   : > { %vm261_vm3 = vcmp.lt.s32.totalorder %v260_v4, 0  ;;  %v262_v9 = vsub.s32 0, %v260_v4  ;;  %v382_v54 = vadd.s32 %v381_v35, %v371_v24  ;;  %vm159_vm8 = vcmp.le.f32.partialorder %v158_v16, 0.7853982 }
  0x74   : > { %v404_v17 = vadd.s32 %v403_v7, %v393_v2  ;;  %v283_v53 = vsel %vm160_vm6, %v282_v46, %v1316_v47  ;;  %vm315_vm13 = vcmp.lt.s32.totalorder %v1193_v15, 0  ;;  %vm301_vm1 = vweird.f32 %v1191_v14 }
  0x75   : > { %v263_v34 = vsel %vm261_vm3, %v262_v9, %v260_v4  ;;  %v383_v11 = vadd.s32 %v382_v54, %v373_v6  ;;  %v285_v58 = vsel %vm159_vm8, 0, %v283_v53  ;;  %vm1345_vm2 = vcmp.le.f32.partialorder %v313_v19, 0.7853982 }
  0x76   : > { %v264_v18 = vclz %v263_v34  ;;  %v405_v20 = vadd.s32 %v404_v17, %v395_v45  ;;  %v302_v0 = vadd.s32 3, %v285_v58  ;;  %v612_v9 = vand.u32 3, %v285_v58 }
  0x77   : > { %vm408_vm4 = vc.u32 %v383_v11, %v402_v10  ;;  %v407_v61 = vadd.s32 %v402_v10, %v383_v11  ;;  %vm152_vm3 = vcmp.lt.f32.partialorder %v1189_v8, 0.5 }
  0x78   : > { %v892_v22 = vadd.s32 4294967294, %v264_v18  ;;  %v409_v23 = vadd.s32 1, %v405_v20  ;;  %v303_v7 = vand.u32 3, %v302_v0  ;;  %vm617_vm11 = vcmp.eq.s32.totalorder %v612_v9, 2 }
  0x79   : > { %vm613_vm15 = vcmp.lt.s32.totalorder %v612_v9, 2  ;;  %vm614_vm0 = vcmp.eq.s32.totalorder %v612_v9, 0 }
  0x7a   : > { %vm893_vm5 = vcmp.lt.s32.totalorder %v892_v22, 0  ;;  %v410_v26 = vsel %vm408_vm4, %v409_v23, %v405_v20  ;;  %vm308_vm10 = vcmp.eq.s32.totalorder %v303_v7, 2  ;;  %vm304_vm12 = vcmp.lt.s32.totalorder %v303_v7, 2 }
  0x7b   : > { %v267_v27 = vsel %vm893_vm5, 0, %v892_v22  ;;  %v411_v28 = vadd.s32 %v410_v26, %v406_v21  ;;  %vm305_vm14 = vcmp.eq.s32.totalorder %v303_v7, 0  ;;  %vm786_vm4 = vcmask 261120  }
  0x7c   : > { %v268_v29 = vsub.s32 32, %v267_v27  ;;  %v269_v1 = vshll.u32 %v260_v4, %v267_v27  ;;  %v272_v31 = vsub.s32 4294967266, %v267_v27 }
  0x7d   : > { %v412_v36 = vadd.s32 536870912, %v411_v28 }
  0x7e   : > { %v270_v32 = vshrl.u32 %v252_v56, %v268_v29  ;;  %v273_v33 = vadd.s32 127, %v272_v31 }
  0x7f   : > { %v1331_v39 = vshrl.u32 %v412_v36, 30 }
  0x80   : > { %v271_v38 = vor.u32 %v270_v32, %v269_v1  ;;  %v274_v30 = vshll.u32 %v273_v33, 23 }
  0x81   : > { %v414_v42 = vshll.u32 %v1331_v39, 30 }
  0x82   : > { %v275_v48 = vor.u32 4788187, %v274_v30  ;;  %v278_v40 = vcvt.s32.f32 %v271_v38  ;;  %v778_v38 = vld [vmem:[%s1183_s24] sm:$0xff] }
  0x83   : > { %v415_v5 = vsub.s32 %v411_v28, %v414_v42  ;;  %v437_v28 = vsub.s32 4, %v1331_v39 }
  0x84   : > { %v276_v44 = vand.u32 2147483647, %v275_v48 }
  0x85   : > { %vm416_vm7 = vcmp.lt.s32.totalorder %v415_v5, 0  ;;  %v417_v49 = vsub.s32 0, %v415_v5  ;;  %v438_v19 = vsel %vm315_vm13, %v437_v28, %v1331_v39 }
  0x86   : > { %v279_v12 = vmul.f32 %v278_v40, %v276_v44 }
  0x87   : > { %v418_v51 = vsel %vm416_vm7, %v417_v49, %v415_v5  ;;  %v440_v49 = vsel %vm1345_vm2, 0, %v438_v19 }
  0x88   : > { %v280_v50 = vxor.u32 2147483648, %v279_v12  ;;  %v419_v55 = vclz %v418_v51  ;;  %v457_v53 = vadd.s32 3, %v440_v49 }
  0x8a   : > { %v281_v41 = vsel %vm160_vm6, %v280_v50, %v279_v12  ;;  %v895_v59 = vadd.s32 4294967294, %v419_v55  ;;  %v458_v58 = vand.u32 3, %v457_v53 }
  0x8b   : > { %v284_v57 = vsel %vm159_vm8, %v1191_v14, %v281_v41  ;;  %v780_v14 = vld [vmem:[%s1183_s24 + $0x10] sm:$0xff] }
  0x8c   : > { %v286_v37 = vmul.f32 %v284_v57, %v284_v57  ;;  %vm896_vm9 = vcmp.lt.s32.totalorder %v895_v59, 0  ;;  %vm463_vm5 = vcmp.eq.s32.totalorder %v458_v58, 2  ;;  %vm459_vm7 = vcmp.lt.s32.totalorder %v458_v58, 2 }
  0x8d   : > { %v422_v62 = vsel %vm896_vm9, 0, %v895_v59  ;;  %vm460_vm8 = vcmp.eq.s32.totalorder %v458_v58, 0 }
  0x8e   : > { %v287_v60 = vmul.f32 -0.001358992, %v286_v37  ;;  %v294_v52 = vmul.f32 -0.00019511016, %v286_v37  ;;  %v423_v43 = vsub.s32 32, %v422_v62  ;;  %v424_v16 = vshll.u32 %v415_v5, %v422_v62 }
  0x8f   : > { %v427_v2 = vsub.s32 4294967266, %v422_v62 }
  0x90   : > { %v288_v63 = vadd.f32 0.041655596, %v287_v60  ;;  %v295_v24 = vadd.f32 0.008332121, %v294_v52  ;;  %v425_v47 = vshrl.u32 %v407_v61, %v423_v43  ;;  %v766_v60 = vand.u32 3, %v440_v49 }
  0x91   : > { %v428_v6 = vadd.s32 127, %v427_v2 }
  0x92   : > { %v289_v3 = vmul.f32 %v288_v63, %v286_v37  ;;  %v296_v4 = vmul.f32 %v295_v24, %v286_v37  ;;  %v426_v45 = vor.u32 %v425_v47, %v424_v16  ;;  %vm771_vm6 = vcmp.eq.s32.totalorder %v766_v60, 2 }
  0x93   : > { %v429_v54 = vshll.u32 %v428_v6, 23  ;;  %vm768_vm9 = vcmp.eq.s32.totalorder %v766_v60, 0 }
  0x94   : > { %v290_v35 = vadd.f32 -0.4999988, %v289_v3  ;;  %v297_v25 = vadd.f32 -0.16666654, %v296_v4  ;;  %v433_v34 = vcvt.s32.f32 %v426_v45 }
  0x95   : > { %v430_v17 = vor.u32 4788187, %v429_v54 }
  0x96   : > { %v291_v13 = vmul.f32 %v290_v35, %v286_v37  ;;  %v298_v10 = vmul.f32 %v297_v25, %v286_v37  ;;  %v779_v35 = vld [vmem:[%s1183_s24 + $0x8] sm:$0xff]  ;;  %v781_v25 = vld [vmem:[%s1183_s24 + $0x18] sm:$0xff] }
  0x97   : > { %v431_v20 = vand.u32 2147483647, %v430_v17 }
  0x98   : > { %v292_v11 = vadd.f32 1.0, %v291_v13  ;;  %v299_v18 = vadd.f32 1.0, %v298_v10 }
  0x99   : > { %v434_v23 = vmul.f32 %v433_v34, %v431_v20 }
  0x9a   : > { %v300_v21 = vmul.f32 %v299_v18, %v284_v57  ;;  %v309_v22 = vxor.u32 2147483648, %v292_v11 }
  0x9b   : > { %v435_v1 = vxor.u32 2147483648, %v434_v23 }
  0x9c   : > { %v306_v56 = vxor.u32 2147483648, %v300_v21  ;;  %v310_v26 = vsel %vm308_vm10, %v309_v22, %v300_v21  ;;  %v619_v27 = vsel %vm617_vm11, %v309_v22, %v300_v21  ;;  %vm767_vm10 = vcmp.lt.s32.totalorder %v766_v60, 2 }
  0x9d   : > { %v436_v30 = vsel %vm315_vm13, %v435_v1, %v434_v23  ;;  %vm456_vm11 = vweird.f32 %v1193_v15 }
  0x9e   : > { %v307_v31 = vsel %vm305_vm14, %v292_v11, %v306_v56  ;;  %v616_v32 = vsel %vm614_vm0, %v292_v11, %v306_v56  ;;  %v439_v42 = vsel %vm1345_vm2, %v1193_v15, %v436_v30 }
  0x9f   : > { %v311_v33 = vsel %vm304_vm12, %v307_v31, %v310_v26  ;;  %v620_v36 = vsel %vm613_vm15, %v616_v32, %v619_v27  ;;  %v441_v5 = vmul.f32 %v439_v42, %v439_v42 }
  0xa0   : > { %v312_v48 = vsel %vm301_vm1, nan, %v311_v33  ;;  %v621_v40 = vsel %vm301_vm1, nan, %v620_v36 }
  0xa1   : > { %v776_v44 = vsel %vm152_vm3, %v312_v48, %v621_v40  ;;  %v442_v50 = vmul.f32 -0.001358992, %v441_v5  ;;  %v449_v51 = vmul.f32 -0.00019511016, %v441_v5 }
  0xa2   : > { %v782_v12 = vadd.f32 %v778_v38, %v776_v44  ;;  %v784_v46 = vadd.f32 %v780_v14, %v776_v44 }
  0xa3   : > { %v443_v39 = vadd.f32 0.041655596, %v442_v50  ;;  %v450_v41 = vadd.f32 0.008332121, %v449_v51 }
  0xa4   : > { %787 = vst.msk [vmem:[%s1367_s17] sm:$0xff] %vm786_vm4, %v782_v12 }
  0xa5   : > { %789 = vst.msk [vmem:[%s1367_s17 + $0x10] sm:$0xff] %vm786_vm4, %v784_v46  ;;  %v444_v55 = vmul.f32 %v443_v39, %v441_v5  ;;  %v451_v57 = vmul.f32 %v450_v41, %v441_v5 }
  0xa7   : > { %v445_v37 = vadd.f32 -0.4999988, %v444_v55  ;;  %v452_v59 = vadd.f32 -0.16666654, %v451_v57 }
  0xa9   : > { %v446_v52 = vmul.f32 %v445_v37, %v441_v5  ;;  %v453_v61 = vmul.f32 %v452_v59, %v441_v5 }
  0xab   : > { %v447_v62 = vadd.f32 1.0, %v446_v52  ;;  %v454_v63 = vadd.f32 1.0, %v453_v61 }
  0xad   : > { %v455_v24 = vmul.f32 %v454_v63, %v439_v42  ;;  %v464_v43 = vxor.u32 2147483648, %v447_v62 }
  0xaf   : > { %v461_v16 = vxor.u32 2147483648, %v455_v24  ;;  %v465_v0 = vsel %vm463_vm5, %v464_v43, %v455_v24  ;;  %v773_v2 = vsel %vm771_vm6, %v464_v43, %v455_v24 }
  0xb1   : > { %v462_v3 = vsel %vm460_vm8, %v447_v62, %v461_v16  ;;  %v770_v4 = vsel %vm768_vm9, %v447_v62, %v461_v16 }
  0xb2   : > { %v466_v47 = vsel %vm459_vm7, %v462_v3, %v465_v0  ;;  %v774_v6 = vsel %vm767_vm10, %v770_v4, %v773_v2 }
  0xb3   : > { %v467_v45 = vsel %vm456_vm11, nan, %v466_v47  ;;  %v775_v7 = vsel %vm456_vm11, nan, %v774_v6 }
  0xb4   : > { %v777_v9 = vsel %vm152_vm3, %v467_v45, %v775_v7 }
  0xb5   : > { %v783_v54 = vadd.f32 %v779_v35, %v777_v9  ;;  %v785_v15 = vadd.f32 %v781_v25, %v777_v9 }
  0xb7   : > { %788 = vst.msk [vmem:[%s1367_s17 + $0x8] sm:$0xff] %vm786_vm4, %v783_v54 }
  0xb8   : > { %790 = vst.msk [vmem:[%s1367_s17 + $0x18] sm:$0xff] %vm786_vm4, %v785_v15 }
  0xb9   : > { %1029 = shalt.err (!%p1026_p4)
}
  0xba   : > { %s1079_s16 = smov 128   ;;  %s1080_s20 = smov 8  }
  0xbb   : > { %915 = dma.vmem_to_hbm [thread:$0]  (%p1141_p11), %s806_s29, 512, %s808_s10, %s792_s30, %s1079_s16, %s1079_s16, %s1080_s20  }
  0xbc PF: > { %s822_s21 = sand.u32 1, %s1056_s6   ;;  %p1425_p7 = scmp.ge.s32.totalorder %s1068_s9, 2 }
  0xbd   : > { %s823_s22 = scalar_lea.sflag [#allocation4], %s822_s21 }
  0xbe   : > { %p922_p5 = pnand %p1425_p7, %p1145_p12 }
  0xc0   : > { %p923_p8 = pneg %p922_p5 }
  0xc2   : > { %1051 = dma.done.wait (%p923_p8), %s823_s22, 512  }
  0xc3   : > { %1053 = vsyncadd (%p923_p8), %s823_s22, 4294966784  ;;  %p14_p10 = scmp.ge.s32.totalorder %s1116_s12, 4   ;;  %s1426_s6 = smov %s1060_s7 }
  0xc4   : > { %s1427_s7 = smov %s1064_s8  ;;  %s1428_s8 = smov %s1128_s15 }
  0xc5   : > { %s1429_s9 = smov %s1116_s12  ;;  %16 = sbr.rel (!%p14_p10) target bundleno = 5 (0x5), region = 69 }
  0xca   :  { %829 = vsyncpa [#allocation3], 1 }
  0xcb   :  { %831 = vsyncpa [#allocation3 + $0x1], 1 }
  0xcc   :  { %832 = vsyncpa [#allocation4], 1 }
  0xcd   :  { %834 = vsyncpa [#allocation4 + $0x1], 1 }

</bundles_post_ra>
